<compile_context>
chip_gen: v7x
topology: tpu7x:2x2x1
jax: 0.10.0
libtpu: 0.0.40
codegen_flags: <defaults>
</compile_context>

<pallas_src>
import functools

import jax
import jax.numpy as jnp
from jax import lax
from jax.experimental import pallas as pl
from jax.experimental.pallas import tpu as pltpu


def pemlp_kernel(w_in_ref, b_in_ref, w_pe_ref, b_pe_ref, w_out_ref, b_out_ref,
                 x_ref, o_ref, *, num_layers, compute_dtype):
    """Fused MLP tile. Activations are feature-major (features, batch_tile)."""
    # ---- input Linear + ReLU ----
    # W_in: (H, D_in), x tile: (TB, D_in) in natural layout -> contract on the
    # last dim of both operands (A @ B^T form, handled natively by Mosaic).
    x = x_ref[...].astype(compute_dtype)
    h = lax.dot_general(w_in_ref[...], x,
                        dimension_numbers=(((1,), (1,)), ((), ())),
                        preferred_element_type=jnp.float32)
    h = jnp.maximum(h + b_in_ref[...], 0.0)                  # (H, TB), f32

    # ---- PELinear layers (weights pre-symmetrized in wrapper) + ReLU ----
    for l in range(num_layers):
        h = jnp.dot(w_pe_ref[l], h.astype(compute_dtype),
                    preferred_element_type=jnp.float32)
        h = jnp.maximum(h + b_pe_ref[l], 0.0)

    # ---- output Linear ----
    # (1, H) @ (H, TB) with M=1 wastes an MXU push/drain: do it as a VPU
    # broadcast multiply + XLU sublane reduction instead (both have slack).
    o_ref[...] = jnp.sum(w_out_ref[...] * h, axis=0, keepdims=True) + b_out_ref[...]


def pemlp_purity_forward(x, kernel_params, *, batch_tile=16384):
    """Fused forward pass of PEMLP_Purity via a single batched Pallas kernel.

    x: (B, D_in) float32.  kernel_params from pack_params_for_kernel.
    Returns (B, 1) float32.
    """
    w_in, b_in, sym_pe, b_pe, w_out_col, b_out = kernel_params
    batch, input_dim = x.shape
    hidden = w_in.shape[0]
    num_layers = sym_pe.shape[0]
    compute_dtype = w_in.dtype

    # Batch rides the lane axis of the output -> tiles are multiples of 128.
    tb = max(128, min(batch_tile, pl.cdiv(batch, 128) * 128))
    tb = (tb // 128) * 128
    # Keep >= 2 grid steps when the batch allows it: the "parallel" grid axis is
    # what v7x shards across its 2 TensorCores (no-op on single-TC v5e/v6e).
    if pl.cdiv(batch, tb) < 2 and batch > 128:
        tb = max(128, pl.cdiv(pl.cdiv(batch, 2), 128) * 128)
    num_tiles = pl.cdiv(batch, tb)
    # VMEM @ tb=16384 (f32): x tile 1 MiB x2 (double-buffered) + h temps ~4-6 MiB
    # + output 64 KiB x2 + weights <0.1 MiB -> well under all chips' scoped
    # limits.  Raise vmem_limit_bytes before pushing batch_tile past ~32768.

    kernel = functools.partial(pemlp_kernel, num_layers=num_layers,
                               compute_dtype=compute_dtype)

    # Weights/biases: full-array blocks with constant index_maps -> stay resident
    # in VMEM across grid steps; only x / output tiles stream.
    const2 = lambda i: (0, 0)
    const3 = lambda i: (0, 0, 0)
    in_specs = [
        pl.BlockSpec((hidden, input_dim), const2),            # W_in
        pl.BlockSpec((hidden, 1), const2),                    # b_in
        pl.BlockSpec((num_layers, hidden, hidden), const3),   # sym PE weights
        pl.BlockSpec((num_layers, hidden, 1), const3),        # PE biases
        pl.BlockSpec((hidden, 1), const2),                    # W_out (column)
        pl.BlockSpec((1, 1), const2),                         # b_out
        pl.BlockSpec((tb, input_dim), lambda i: (i, 0)),      # x (natural layout)
    ]
    out_spec = pl.BlockSpec((1, tb), lambda i: (0, i))        # lane-dense output

    flops = 2 * num_tiles * tb * (input_dim * hidden
                                  + num_layers * hidden * hidden
                                  + hidden)
    weight_bytes = sum(a.size * a.dtype.itemsize
                       for a in (w_in, b_in, sym_pe, b_pe, w_out_col, b_out))
    bytes_accessed = (batch * input_dim * x.dtype.itemsize   # x read
                      + batch * 4                            # y write
                      + weight_bytes)

    yT = pl.pallas_call(
        kernel,
        out_shape=jax.ShapeDtypeStruct((1, batch), jnp.float32),
        grid=(num_tiles,),
        in_specs=in_specs,
        out_specs=out_spec,
        compiler_params=pltpu.CompilerParams(
            dimension_semantics=("parallel",)),
        cost_estimate=pl.CostEstimate(
            flops=flops, transcendentals=0, bytes_accessed=bytes_accessed),
    )(w_in, b_in, sym_pe, b_pe, w_out_col, b_out, x)

    return yT.reshape(batch, 1)


def init_params(key, input_dim, hidden_dim=32, num_layers=2):
    """Deterministic synthetic parameters matching the PyTorch module's shapes."""
    k = jax.random.split(key, 6)
    # nn.Linear(input_dim, hidden_dim): weight (H, D_in), bias (H,)
    w_in = jax.random.normal(k[0], (hidden_dim, input_dim), jnp.float32) * 0.1
    b_in = jax.random.normal(k[1], (hidden_dim,), jnp.float32) * 0.1
    # PELinear: weight ~ randn(H, H), bias zeros(H)  (num_layers of them)
    w_pe = jax.random.normal(k[2], (num_layers, hidden_dim, hidden_dim), jnp.float32)
    b_pe = jnp.zeros((num_layers, hidden_dim), jnp.float32)
    # nn.Linear(hidden_dim, 1): weight (1, H), bias (1,)
    w_out = jax.random.normal(k[3], (1, hidden_dim), jnp.float32) * 0.1
    b_out = jax.random.normal(k[4], (1,), jnp.float32) * 0.1
    return w_in, b_in, w_pe, b_pe, w_out, b_out


def pack_params_for_kernel(params, compute_dtype=jnp.float32):
    """Glue: pre-symmetrize PE weights (loop-invariant), column-vector biases,
    optional bf16 weight cast (MXU-native rate; accumulation stays f32)."""
    w_in, b_in, w_pe, b_pe, w_out, b_out = params
    hidden = w_in.shape[0]
    num_layers = w_pe.shape[0]
    sym_pe = (w_pe + jnp.transpose(w_pe, (0, 2, 1))) * 0.5
    return (
        w_in.astype(compute_dtype),             # (H, D_in)
        b_in.reshape(hidden, 1),                # (H, 1)   f32
        sym_pe.astype(compute_dtype),           # (L, H, H)
        b_pe.reshape(num_layers, hidden, 1),    # (L, H, 1) f32
        jnp.transpose(w_out),                   # (H, 1)   f32 (VPU output layer)
        b_out.reshape(1, 1),                    # (1, 1)   f32
    )


def pemlp_purity_ref(x, params):
    """Pure-JAX reference mirroring the PyTorch forward exactly."""
    w_in, b_in, w_pe, b_pe, w_out, b_out = params
    h = jnp.maximum(x @ w_in.T + b_in, 0.0)
    for l in range(w_pe.shape[0]):
        sym = (w_pe[l] + w_pe[l].T) / 2.0
        h = jnp.maximum(h @ sym + b_pe[l], 0.0)
    return h @ w_out.T + b_out


if __name__ == "__main__":
    input_dim, hidden_dim, num_layers = 16, 32, 2

    key = jax.random.PRNGKey(0)
    kx, kp = jax.random.split(key)
    params = init_params(kp, input_dim, hidden_dim, num_layers)
    kernel_params = pack_params_for_kernel(params)           # f32 compute

    # Small batch (single tile, partial block handled by Pallas).
    batch = 8
    x = jax.random.normal(kx, (batch, input_dim), jnp.float32)
    out = jax.block_until_ready(pemlp_purity_forward(x, kernel_params))
    ref = pemlp_purity_ref(x, params)
    assert out.shape == (batch, 1), out.shape
    assert jnp.allclose(out, ref, atol=1e-4, rtol=1e-4), (out, ref)

    # Multi-tile path (exercises >= 2 grid steps + ragged boundary tile).
    batch2 = 300
    x2 = jax.random.normal(kx, (batch2, input_dim), jnp.float32)
    out2 = jax.block_until_ready(pemlp_purity_forward(x2, kernel_params))
    ref2 = pemlp_purity_ref(x2, params)
    assert out2.shape == (batch2, 1), out2.shape
    assert jnp.allclose(out2, ref2, atol=1e-4, rtol=1e-4), (out2, ref2)

    # Optional bf16-weight path (MXU-native rate); smoke-run only — numerics
    # differ from the f32 reference beyond the 1e-4 tolerance by design.
    kernel_params_bf16 = pack_params_for_kernel(params, compute_dtype=jnp.bfloat16)
    _ = jax.block_until_ready(pemlp_purity_forward(x2, kernel_params_bf16))

    print("KERNEL_OK")
</pallas_src>

<mosaic_0001>
module attributes {stable_mosaic.version = 11 : i64} {
  func.func @pemlp_kernel(%arg0: i32, %arg1: memref<32x16xf32, #tpu.memory_space<vmem>>, %arg2: memref<32x1xf32, #tpu.memory_space<vmem>>, %arg3: memref<2x32x32xf32, #tpu.memory_space<vmem>>, %arg4: memref<2x32x1xf32, #tpu.memory_space<vmem>>, %arg5: memref<32x1xf32, #tpu.memory_space<vmem>>, %arg6: memref<1x1xf32, #tpu.memory_space<vmem>>, %arg7: memref<128x16xf32, #tpu.memory_space<vmem>>, %arg8: memref<1x128xf32, #tpu.memory_space<vmem>>) attributes {dimension_semantics = [#tpu.dimension_semantics<parallel>], iteration_bounds = array<i64: 1>, scalar_prefetch = 0 : i64, scratch_operands = 0 : i64, tpu.core_type = #tpu.core_type<tc>, window_params = [{pipeline_mode = #tpu.pipeline_mode<synchronous>, transform_indices = @transform_0, window_bounds = array<i64: 32, 16>}, {pipeline_mode = #tpu.pipeline_mode<synchronous>, transform_indices = @transform_1, window_bounds = array<i64: 32, 1>}, {pipeline_mode = #tpu.pipeline_mode<synchronous>, transform_indices = @transform_2, window_bounds = array<i64: 2, 32, 32>}, {pipeline_mode = #tpu.pipeline_mode<synchronous>, transform_indices = @transform_3, window_bounds = array<i64: 2, 32, 1>}, {pipeline_mode = #tpu.pipeline_mode<synchronous>, transform_indices = @transform_4, window_bounds = array<i64: 32, 1>}, {pipeline_mode = #tpu.pipeline_mode<synchronous>, transform_indices = @transform_5, window_bounds = array<i64: 1, 1>}, {transform_indices = @transform_6, window_bounds = array<i64: 128, 16>}, {transform_indices = @transform_7, window_bounds = array<i64: 1, 128>}]} {
    %c0 = arith.constant 0 : index
    %c0_0 = arith.constant 0 : index
    %0 = vector.load %arg7[%c0, %c0_0] : memref<128x16xf32, #tpu.memory_space<vmem>>, vector<128x16xf32>
    %c0_1 = arith.constant 0 : index
    %c0_2 = arith.constant 0 : index
    %1 = vector.load %arg1[%c0_1, %c0_2] : memref<32x16xf32, #tpu.memory_space<vmem>>, vector<32x16xf32>
    %cst = arith.constant dense<0.000000e+00> : vector<32x128xf32>
    %2 = tpu.matmul %1, %0, %cst {dimension_numbers = #tpu.dot_dimension_numbers<[1], [1], [0], [0], [0, 0, 1, 0], [], []>} : vector<32x16xf32>, vector<128x16xf32>, vector<32x128xf32> -> vector<32x128xf32>
    %c0_3 = arith.constant 0 : index
    %c0_4 = arith.constant 0 : index
    %3 = vector.load %arg2[%c0_3, %c0_4] : memref<32x1xf32, #tpu.memory_space<vmem>>, vector<32x1xf32>
    %4 = vector.broadcast %3 : vector<32x1xf32> to vector<32x128xf32>
    %5 = arith.addf %2, %4 : vector<32x128xf32>
    %cst_5 = arith.constant 0.000000e+00 : f32
    %6 = vector.broadcast %cst_5 : f32 to vector<32x128xf32>
    %7 = arith.maximumf %5, %6 : vector<32x128xf32>
    %c0_6 = arith.constant 0 : index
    %c0_7 = arith.constant 0 : index
    %c0_8 = arith.constant 0 : index
    %8 = vector.load %arg3[%c0_6, %c0_7, %c0_8] : memref<2x32x32xf32, #tpu.memory_space<vmem>>, vector<1x32x32xf32>
    %9 = vector.shape_cast %8 : vector<1x32x32xf32> to vector<32x32xf32>
    %cst_9 = arith.constant dense<0.000000e+00> : vector<32x128xf32>
    %10 = tpu.matmul %9, %7, %cst_9 {dimension_numbers = #tpu.dot_dimension_numbers<[1], [0], [0], [1], [0, 0, 1, 1], [], []>} : vector<32x32xf32>, vector<32x128xf32>, vector<32x128xf32> -> vector<32x128xf32>
    %c0_10 = arith.constant 0 : index
    %c0_11 = arith.constant 0 : index
    %c0_12 = arith.constant 0 : index
    %11 = vector.load %arg4[%c0_10, %c0_11, %c0_12] : memref<2x32x1xf32, #tpu.memory_space<vmem>>, vector<1x32x1xf32>
    %12 = vector.shape_cast %11 : vector<1x32x1xf32> to vector<32x1xf32>
    %13 = vector.broadcast %12 : vector<32x1xf32> to vector<32x128xf32>
    %14 = arith.addf %10, %13 : vector<32x128xf32>
    %cst_13 = arith.constant 0.000000e+00 : f32
    %15 = vector.broadcast %cst_13 : f32 to vector<32x128xf32>
    %16 = arith.maximumf %14, %15 : vector<32x128xf32>
    %c1 = arith.constant 1 : index
    %c0_14 = arith.constant 0 : index
    %c0_15 = arith.constant 0 : index
    %17 = vector.load %arg3[%c1, %c0_14, %c0_15] : memref<2x32x32xf32, #tpu.memory_space<vmem>>, vector<1x32x32xf32>
    %18 = vector.shape_cast %17 : vector<1x32x32xf32> to vector<32x32xf32>
    %cst_16 = arith.constant dense<0.000000e+00> : vector<32x128xf32>
    %19 = tpu.matmul %18, %16, %cst_16 {dimension_numbers = #tpu.dot_dimension_numbers<[1], [0], [0], [1], [0, 0, 1, 1], [], []>} : vector<32x32xf32>, vector<32x128xf32>, vector<32x128xf32> -> vector<32x128xf32>
    %c1_17 = arith.constant 1 : index
    %c0_18 = arith.constant 0 : index
    %c0_19 = arith.constant 0 : index
    %20 = vector.load %arg4[%c1_17, %c0_18, %c0_19] : memref<2x32x1xf32, #tpu.memory_space<vmem>>, vector<1x32x1xf32>
    %21 = vector.shape_cast %20 : vector<1x32x1xf32> to vector<32x1xf32>
    %22 = vector.broadcast %21 : vector<32x1xf32> to vector<32x128xf32>
    %23 = arith.addf %19, %22 : vector<32x128xf32>
    %cst_20 = arith.constant 0.000000e+00 : f32
    %24 = vector.broadcast %cst_20 : f32 to vector<32x128xf32>
    %25 = arith.maximumf %23, %24 : vector<32x128xf32>
    %c0_21 = arith.constant 0 : index
    %c0_22 = arith.constant 0 : index
    %26 = vector.load %arg5[%c0_21, %c0_22] : memref<32x1xf32, #tpu.memory_space<vmem>>, vector<32x1xf32>
    %27 = vector.broadcast %26 : vector<32x1xf32> to vector<32x128xf32>
    %28 = arith.mulf %27, %25 : vector<32x128xf32>
    %cst_23 = arith.constant dense<0.000000e+00> : vector<128xf32>
    %29 = vector.multi_reduction <add>, %28, %cst_23 [0] : vector<32x128xf32> to vector<128xf32>
    %30 = vector.shape_cast %29 : vector<128xf32> to vector<1x128xf32>
    %c0_24 = arith.constant 0 : index
    %c0_25 = arith.constant 0 : index
    %31 = vector.load %arg6[%c0_24, %c0_25] : memref<1x1xf32, #tpu.memory_space<vmem>>, vector<1x1xf32>
    %32 = vector.broadcast %31 : vector<1x1xf32> to vector<1x128xf32>
    %33 = arith.addf %30, %32 : vector<1x128xf32>
    %c0_26 = arith.constant 0 : index
    %c0_27 = arith.constant 0 : index
    %34 = vector.load %arg8[%c0_26, %c0_27] : memref<1x128xf32, #tpu.memory_space<vmem>>, vector<1x128xf32>
    tpu.vector_store %arg8[%c0_26, %c0_27], %33 {strides = array<i32>} : memref<1x128xf32, #tpu.memory_space<vmem>>, vector<1x128xf32>,
    return
  }
  func.func @transform_0(%arg0: i32) -> (i32, i32) {
    %c0_i32 = arith.constant 0 : i32
    %c0_i32_0 = arith.constant 0 : i32
    %c0_i32_1 = arith.constant 0 : i32
    return %c0_i32, %c0_i32_0 : i32, i32
  }
  func.func @transform_1(%arg0: i32) -> (i32, i32) {
    %c0_i32 = arith.constant 0 : i32
    %c0_i32_0 = arith.constant 0 : i32
    %c0_i32_1 = arith.constant 0 : i32
    return %c0_i32, %c0_i32_0 : i32, i32
  }
  func.func @transform_2(%arg0: i32) -> (i32, i32, i32) {
    %c0_i32 = arith.constant 0 : i32
    %c0_i32_0 = arith.constant 0 : i32
    %c0_i32_1 = arith.constant 0 : i32
    %c0_i32_2 = arith.constant 0 : i32
    return %c0_i32, %c0_i32_0, %c0_i32_1 : i32, i32, i32
  }
  func.func @transform_3(%arg0: i32) -> (i32, i32, i32) {
    %c0_i32 = arith.constant 0 : i32
    %c0_i32_0 = arith.constant 0 : i32
    %c0_i32_1 = arith.constant 0 : i32
    %c0_i32_2 = arith.constant 0 : i32
    return %c0_i32, %c0_i32_0, %c0_i32_1 : i32, i32, i32
  }
  func.func @transform_4(%arg0: i32) -> (i32, i32) {
    %c0_i32 = arith.constant 0 : i32
    %c0_i32_0 = arith.constant 0 : i32
    %c0_i32_1 = arith.constant 0 : i32
    return %c0_i32, %c0_i32_0 : i32, i32
  }
  func.func @transform_5(%arg0: i32) -> (i32, i32) {
    %c0_i32 = arith.constant 0 : i32
    %c0_i32_0 = arith.constant 0 : i32
    %c0_i32_1 = arith.constant 0 : i32
    return %c0_i32, %c0_i32_0 : i32, i32
  }
  func.func @transform_6(%arg0: i32) -> (i32, i32) {
    %c0_i32 = arith.constant 0 : i32
    %c0_i32_0 = arith.constant 0 : i32
    return %arg0, %c0_i32 : i32, i32
  }
  func.func @transform_7(%arg0: i32) -> (i32, i32) {
    %c0_i32 = arith.constant 0 : i32
    %c0_i32_0 = arith.constant 0 : i32
    return %c0_i32, %arg0 : i32, i32
  }
}

</mosaic_0001>

<bundles_post_ra>
// kernel: tpu_custom_call.1
= control target key start
LH: loop header
LB: loop body
LE: loop exit
PB: predicated region body
PF: predicated region fallthrough
CT: control target
= control target key end

     0   :  { %s1016_s0 = inlined_call_operand.vmem [shape: f32[32,16], index: 0, kind: input, shape index: {}]   ;;  %s1017_s1 = inlined_call_operand.vmem [shape: f32[32,1], index: 1, kind: input, shape index: {}]   ;;  %s1018_s2 = inlined_call_operand.vmem [shape: f32[2,32,32], index: 2, kind: input, shape index: {}]   ;;  %s1019_s3 = inlined_call_operand.vmem [shape: f32[2,32,1], index: 3, kind: input, shape index: {}]   ;;  %s1020_s4 = inlined_call_operand.vmem [shape: f32[32,1], index: 4, kind: input, shape index: {}]   ;;  %s1021_s5 = inlined_call_operand.<no memory space> [shape: f32[1,1], index: 5, kind: input, shape index: {}]   ;;  %s1022_s6 = inlined_call_operand.vmem [shape: f32[8,16], index: 6, kind: input, shape index: {}]   ;;  %s1023_s7 = inlined_call_operand.hbm [shape: f32[1,8], index: 7, kind: output, shape index: {}]  }
   0x1   :  { %v12_v0 = vstv %s1021_s5 }
   0x2   :  { %13 = vst [vmem:[#allocation2] sm:$0x1] %v12_v0 }
   0x3   :  { %v29_v1 = vld [vmem:[%s1022_s6] sm:$0xff]  ;;  %v30_v2 = vld [vmem:[%s1022_s6 + $0x8] sm:$0xff]  ;;  %vm73_vm0 = vcmask 130048   ;;  %v31_v3 = vld [vmem:[%s1022_s6 + $0x10] sm:$0xff]  ;;  %v777_v7 = vmov 0  }
   0x4   :  { %v685_v4 = vpack.c.bf16 %v30_v2, %v29_v1  ;;  %vm833_vm1 = vmpackc.low %vm73_vm0, %vm73_vm0  ;;  %v32_v6 = vld [vmem:[%s1022_s6 + $0x18] sm:$0xff]  ;;  %751 = vset.pattern.permute.xlu0 %v777_v7  ;;  %752 = vset.pattern.permute.xlu1 %v777_v7  ;;  %v45_v9 = vld [vmem:[%s1016_s0] sm:$0xff] }
   0x5   :  { %v691_v8 = vpack.c.bf16 %v32_v6, %v31_v3  ;;  %v33_v10 = vld [vmem:[%s1022_s6 + $0x20] sm:$0xff]  ;;  %v34_v11 = vld [vmem:[%s1022_s6 + $0x28] sm:$0xff]  ;;  %651 = vmatprep.mubr.msk.f32.mxu0 %vm73_vm0, %v45_v9  ;;  %v51_v13 = vld [vmem:[%s1017_s1 + $0x10] sm:$0xff] }
   0x6   :  { %687 = vmatprep.subr.msk.bf16.mxu0 %vm833_vm1, %v685_v4  ;;  %v49_v12 = vld [vmem:[%s1017_s1] sm:$0xff]  ;;  %65 = vperm.xlu1 %752, %v51_v13   ;;  %v697_v14 = vpack.c.bf16 %v34_v11, %v33_v10  ;;  %v50_v15 = vld [vmem:[%s1017_s1 + $0x8] sm:$0xff]  ;;  %v52_v16 = vld [vmem:[%s1017_s1 + $0x18] sm:$0xff] }
   0x7   :  { %690 = vmatpush3.bf16.xpose.msk.msra.mxu0 %vm833_vm1, %v685_v4  ;;  %55 = vperm.xlu0 %751, %v49_v12  }
   0x8   :  { %693 = vmatprep.subr.msk.bf16.mxu0 %vm833_vm1, %v691_v8 }
   0xb   :  { %60 = vperm.xlu0 %751, %v50_v15  }
   0xf   :  { %696 = vmatpush3.bf16.xpose.msk.msra.mxu0 %vm833_vm1, %v691_v8 }
  0x10   :  { %14 = vsyncpa [#allocation4], 0  ;;  %699 = vmatprep.subr.msk.bf16.mxu0 %vm833_vm1, %v697_v14  ;;  %v227_v17 = vld [vmem:[%s1019_s3] sm:$0xff]  ;;  %70 = vperm.xlu1 %752, %v52_v16   ;;  %v35_v18 = vld [vmem:[%s1022_s6 + $0x30] sm:$0xff]  ;;  %vm251_vm2 = vcmask 261120  }
  0x11   :  { %v36_v19 = vld [vmem:[%s1022_s6 + $0x38] sm:$0xff]  ;;  %v228_v20 = vld [vmem:[%s1019_s3 + $0x8] sm:$0xff]  ;;  %233 = vperm.xlu0 %751, %v227_v17   ;;  %v229_v22 = vld [vmem:[%s1019_s3 + $0x10] sm:$0xff] }
  0x12   :  { %v703_v21 = vpack.c.bf16 %v36_v19, %v35_v18  ;;  %v230_v23 = vld [vmem:[%s1019_s3 + $0x18] sm:$0xff]  ;;  %v575_v24 = vld [vmem:[%s1019_s3 + $0x20] sm:$0xff]  ;;  %v38_v26 = vld [vmem:[%s1022_s6 + $0x48] sm:$0xff] }
  0x13   :  { %v37_v25 = vld [vmem:[%s1022_s6 + $0x40] sm:$0xff]  ;;  %v576_v27 = vld [vmem:[%s1019_s3 + $0x28] sm:$0xff]  ;;  %v577_v29 = vld [vmem:[%s1019_s3 + $0x30] sm:$0xff] }
  0x14   :  { %238 = vperm.xlu1 %752, %v228_v20   ;;  %v709_v28 = vpack.c.bf16 %v38_v26, %v37_v25  ;;  %v578_v30 = vld [vmem:[%s1019_s3 + $0x38] sm:$0xff]  ;;  %v484_v31 = vld [vmem:[%s1020_s4] sm:$0xff]  ;;  %v39_v32 = vld [vmem:[%s1022_s6 + $0x50] sm:$0xff] }
  0x15   :  { %243 = vperm.xlu0 %751, %v229_v22   ;;  %v40_v33 = vld [vmem:[%s1022_s6 + $0x58] sm:$0xff]  ;;  %v485_v34 = vld [vmem:[%s1020_s4 + $0x8] sm:$0xff]  ;;  %v486_v36 = vld [vmem:[%s1020_s4 + $0x10] sm:$0xff] }
  0x16   :  { %v715_v35 = vpack.c.bf16 %v40_v33, %v39_v32  ;;  %v487_v37 = vld [vmem:[%s1020_s4 + $0x18] sm:$0xff]  ;;  %v521_v38 = vld [vmem:[#allocation2] sm:$0x1]  ;;  %v42_v40 = vld [vmem:[%s1022_s6 + $0x68] sm:$0xff] }
  0x17   :  { %702 = vmatpush3.bf16.xpose.msk.msra.mxu0 %vm833_vm1, %v697_v14  ;;  %v41_v39 = vld [vmem:[%s1022_s6 + $0x60] sm:$0xff]  ;;  %v43_v42 = vld [vmem:[%s1022_s6 + $0x70] sm:$0xff]  ;;  %v44_v43 = vld [vmem:[%s1022_s6 + $0x78] sm:$0xff] }
  0x18   :  { %705 = vmatprep.subr.msk.bf16.mxu0 %vm833_vm1, %v703_v21  ;;  %248 = vperm.xlu1 %752, %v230_v23   ;;  %v721_v41 = vpack.c.bf16 %v42_v40, %v41_v39  ;;  %v727_v44 = vpack.c.bf16 %v44_v43, %v43_v42  ;;  %v46_v45 = vld [vmem:[%s1016_s0 + $0x8] sm:$0xff]  ;;  %v47_v46 = vld [vmem:[%s1016_s0 + $0x10] sm:$0xff]  ;;  %v48_v47 = vld [vmem:[%s1016_s0 + $0x18] sm:$0xff] }
  0x19   :  { %365 = vperm.xlu0 %751, %v575_v24   ;;  %v223_v48 = vld [vmem:[%s1018_s2] sm:$0xff]  ;;  %v224_v3 = vld [vmem:[%s1018_s2 + $0x8] sm:$0xff]  ;;  %v225_v4 = vld [vmem:[%s1018_s2 + $0x10] sm:$0xff] }
  0x1a   :  { %665 = vmatprep.mubr.msk.f32.mxu1 %vm251_vm2, %v223_v48  ;;  %v226_v5 = vld [vmem:[%s1018_s2 + $0x18] sm:$0xff]  ;;  %v571_v6 = vld [vmem:[%s1018_s2 + $0x20] sm:$0xff]  ;;  %v572_v25 = vld [vmem:[%s1018_s2 + $0x28] sm:$0xff] }
  0x1b   :  { %v573_v26 = vld [vmem:[%s1018_s2 + $0x30] sm:$0xff] }
  0x1c   :  { %370 = vperm.xlu1 %752, %v576_v27   ;;  %v574_v27 = vld [vmem:[%s1018_s2 + $0x38] sm:$0xff]  ;;  %s778_s2 = smov [#allocation3]  }
  0x1d   :  { %375 = vperm.xlu0 %751, %v577_v29   ;;  %s539_s10 = sshll.u32 %s778_s2, 4  ;;  %s540_s10 = int_to_ptr.vmem [resolvable:$true] %s539_s10 }
  0x1e   :  { %s753_s11 = scalar_lea.vmem %s540_s10, 16  ;;  %s757_s12 = scalar_lea.vmem %s540_s10, 32 }
  0x1f   :  { %708 = vmatpush3.bf16.xpose.msk.msra.mxu0 %vm833_vm1, %v703_v21  ;;  %p754_p0 = scmp.ne.s32.totalorder %s540_s10, %s753_s11  ;;  %p758_p1 = scmp.lt.s32.totalorder %s540_s10, %s540_s10 }
  0x20   :  { %711 = vmatprep.subr.msk.bf16.mxu0 %vm833_vm1, %v709_v28  ;;  %380 = vperm.xlu1 %752, %v578_v30   ;;  %p759_p2 = scmp.lt.s32.totalorder %s757_s12, %s753_s11 }
  0x21   :  { %490 = vperm.xlu0 %751, %v484_v31  }
  0x22   :  { %p760_p3 = por %p759_p2, %p758_p1 }
  0x24   :  { %495 = vperm.xlu1 %752, %v485_v34   ;;  %p761_p4 = pnand %p760_p3, %p754_p0 }
  0x25   :  { %500 = vperm.xlu0 %751, %v486_v36  }
  0x27   :  { %714 = vmatpush3.bf16.xpose.msk.msra.mxu0 %vm833_vm1, %v709_v28 }
  0x28   :  { %717 = vmatprep.subr.msk.bf16.mxu0 %vm833_vm1, %v715_v35  ;;  %505 = vperm.xlu1 %752, %v487_v37  }
  0x29   :  { %524 = vperm.xlu0 %751, %v521_v38  }
  0x2f   :  { %720 = vmatpush3.bf16.xpose.msk.msra.mxu0 %vm833_vm1, %v715_v35 }
  0x30   :  { %723 = vmatprep.subr.msk.bf16.mxu0 %vm833_vm1, %v721_v41 }
  0x37   :  { %726 = vmatpush3.bf16.xpose.msk.msra.mxu0 %vm833_vm1, %v721_v41 }
  0x38   :  { %729 = vmatprep.subr.msk.bf16.mxu0 %vm833_vm1, %v727_v44 }
  0x3f   :  { %732 = vmatpush3.bf16.xpose.msk.msra.mxu0 %vm833_vm1, %v727_v44 }
  0x46   :  { %652 = vmatmul.mubr.msk.f32.vlgmr.msra.gmra.mrb[0].mxu0 %vm73_vm0, %v46_v45 }
  0x47   :  { %654 = vmatprep.mubr.msk.f32.mxu0 %vm73_vm0, %v47_v46 }
  0x4a   :  { %655 = vmatmul.mubr.msk.f32.gmra.mrb[2].mxu0 %vm73_vm0, %v48_v47 }
  0x85   :  { %v66_v50 = vpop.permute.xlu1 %65 }
  0x86   :  { %v56_v49 = vpop.permute.xlu0 %55 }
  0x8a   :  { %v61_v51 = vpop.permute.xlu0 %60 }
  0x8f   :  { %v71_v57 = vpop.permute.xlu1 %70 }
  0x90   :  { %v234_v8 = vpop.permute.xlu0 %233 }
  0x93   :  { %v239_v7 = vpop.permute.xlu1 %238 }
  0x94   :  { %v244_v17 = vpop.permute.xlu0 %243 }
  0x97   :  { %v249_v14 = vpop.permute.xlu1 %248 }
  0x98   :  { %v366_v28 = vpop.permute.xlu0 %365 }
  0x9b   :  { %v371_v29 = vpop.permute.xlu1 %370 }
  0x9c   :  { %v376_v30 = vpop.permute.xlu0 %375 }
  0x9f   :  { %v381_v31 = vpop.permute.xlu1 %380 }
  0xa0   :  { %v491_v36 = vpop.permute.xlu0 %490 }
  0xa3   :  { %v496_v38 = vpop.permute.xlu1 %495 }
 0x119   :  { %v653_v52 = vpop.f32.mrb[0].mxu0 }
 0x11a   :  { %v206_v53 = vadd.f32 %v653_v52, %v61_v51  ;;  %v200_v54 = vpop.f32.mrb[1].mxu0  ;;  %v506_v51 = vpop.permute.xlu1 %505 }
 0x11b   :  { %v201_v55 = vadd.f32 %v200_v54, %v56_v49  ;;  %v501_v49 = vpop.permute.xlu0 %500  ;;  %v527_v54 = vlaneseq }
 0x11c   :  { %v220_v56 = vmax.f32 %v206_v53, 0.0 }
 0x11d   :  { %v219_v58 = vmax.f32 %v201_v55, 0.0  ;;  %v656_v59 = vpop.f32.mrb[2].mxu0 }
 0x11e   :  { %v216_v60 = vadd.f32 %v656_v59, %v71_v57  ;;  %v210_v61 = vpop.f32.mrb[3].mxu0  ;;  %v528_v57 = vshrl.u32 %v527_v54, 7 }
 0x11f   :  { %v211_v62 = vadd.f32 %v210_v61, %v66_v50  ;;  %v733_v63 = vpack.c.bf16 %v220_v56, %v219_v58 }
 0x120   :  { %v222_v0 = vmax.f32 %v216_v60, 0.0  ;;  %v529_v60 = vsub.s32 0, %v528_v57 }
 0x121   :  { %v221_v1 = vmax.f32 %v211_v62, 0.0  ;;  %734 = vmatprep.subr.bf16.mxu1 %v733_v63  ;;  %v525_v62 = vpop.permute.xlu0 %524 }
 0x122   :  { %736 = vmatpush3.bf16.msra.mxu1 %v733_v63 }
 0x123   :  { %v737_v2 = vpack.c.bf16 %v222_v0, %v221_v1  ;;  %v530_v0 = vrot.slane %v525_v62, %v529_v60 }
 0x125   :  { %738 = vmatprep.subr.bf16.mxu1 %v737_v2 }
 0x126   :  { %740 = vmatpush3.bf16.msra.mxu1 %v737_v2 }
 0x129   :  { %666 = vmatmul.mubr.msk.f32.vlgmr.msra.gmra.mrb[0].mxu1 %vm251_vm2, %v224_v3 }
 0x12a   :  { %668 = vmatprep.mubr.msk.f32.mxu1 %vm251_vm2, %v225_v4 }
 0x12d   :  { %669 = vmatmul.mubr.msk.f32.gmra.mrb[2].mxu1 %vm251_vm2, %v226_v5 }
 0x12e   :  { %679 = vmatprep.mubr.msk.f32.mxu1 %vm251_vm2, %v571_v6 }
 0x1fc   :  { %v667_v9 = vpop.f32.mrb[0].mxu1 }
 0x1fd   :  { %v336_v10 = vadd.f32 %v667_v9, %v239_v7  ;;  %v330_v11 = vpop.f32.mrb[1].mxu1 }
 0x1fe   :  { %v331_v12 = vadd.f32 %v330_v11, %v234_v8 }
 0x1ff   :  { %v350_v13 = vmax.f32 %v336_v10, 0.0 }
 0x200   :  { %v349_v15 = vmax.f32 %v331_v12, 0.0  ;;  %v670_v16 = vpop.f32.mrb[2].mxu1 }
 0x201   :  { %v346_v18 = vadd.f32 %v670_v16, %v249_v14  ;;  %v340_v19 = vpop.f32.mrb[3].mxu1 }
 0x202   :  { %v741_v20 = vpack.c.bf16 %v350_v13, %v349_v15  ;;  %v341_v21 = vadd.f32 %v340_v19, %v244_v17 }
 0x203   :  { %v352_v22 = vmax.f32 %v346_v18, 0.0 }
 0x204   :  { %v351_v23 = vmax.f32 %v341_v21, 0.0  ;;  %742 = vmatprep.subr.bf16.mxu1 %v741_v20 }
 0x205   :  { %744 = vmatpush3.bf16.msra.mxu1 %v741_v20 }
 0x206   :  { %v745_v24 = vpack.c.bf16 %v352_v22, %v351_v23 }
 0x208   :  { %746 = vmatprep.subr.bf16.mxu1 %v745_v24 }
 0x209   :  { %748 = vmatpush3.bf16.msra.mxu1 %v745_v24 }
 0x20c   :  { %680 = vmatmul.mubr.msk.f32.vlgmr.msra.gmra.mrb[4].mxu1 %vm251_vm2, %v572_v25 }
 0x20d   :  { %682 = vmatprep.mubr.msk.f32.mxu1 %vm251_vm2, %v573_v26 }
 0x210   :  { %683 = vmatmul.mubr.msk.f32.gmra.mrb[6].mxu1 %vm251_vm2, %v574_v27 }
 0x2df   :  { %v681_v32 = vpop.f32.mrb[4].mxu1 }
 0x2e0   :  { %v467_v33 = vadd.f32 %v681_v32, %v371_v29  ;;  %v461_v34 = vpop.f32.mrb[5].mxu1 }
 0x2e1   :  { %v462_v35 = vadd.f32 %v461_v34, %v366_v28 }
 0x2e2   :  { %v481_v37 = vmax.f32 %v467_v33, 0.0 }
 0x2e3   :  { %v480_v39 = vmax.f32 %v462_v35, 0.0  ;;  %v684_v40 = vpop.f32.mrb[6].mxu1 }
 0x2e4   :  { %v509_v41 = vmul.f32 %v496_v38, %v481_v37  ;;  %v477_v42 = vadd.f32 %v684_v40, %v381_v31  ;;  %v471_v43 = vpop.f32.mrb[7].mxu1 }
 0x2e5   :  { %v508_v44 = vmul.f32 %v491_v36, %v480_v39  ;;  %v472_v45 = vadd.f32 %v471_v43, %v376_v30 }
 0x2e6   :  { %v483_v47 = vmax.f32 %v477_v42, 0.0 }
 0x2e7   :  { %v512_v46 = vadd.f32 %v509_v41, %v508_v44  ;;  %v482_v48 = vmax.f32 %v472_v45, 0.0 }
 0x2e8   :  { %v511_v52 = vmul.f32 %v506_v51, %v483_v47 }
 0x2e9   :  { %v510_v50 = vmul.f32 %v501_v49, %v482_v48 }
 0x2eb   :  { %v513_v53 = vadd.f32 %v512_v46, %v510_v50 }
 0x2ed   :  { %v514_v55 = vadd.f32 %v513_v53, %v511_v52 }
 0x2ef   :  { %v515_v56 = vrot.slane %v514_v55, 4 }
 0x2f1   :  { %v516_v58 = vadd.f32 %v515_v56, %v514_v55 }
 0x2f3   :  { %v517_v59 = vrot.slane %v516_v58, 2 }
 0x2f5   :  { %v518_v61 = vadd.f32 %v517_v59, %v516_v58 }
 0x2f7   :  { %v519_v63 = vrot.slane %v518_v61, 1 }
 0x2f9   :  { %v520_v1 = vadd.f32 %v519_v63, %v518_v61 }
 0x2fb   :  { %v531_v2 = vadd.f32 %v530_v0, %v520_v1 }
 0x2fd   :  { %532 = vst [vmem:[#allocation3] sm:$0x1] %v531_v2 }
 0x2fe   :  { %764 = shalt.err (!%p761_p4)
}
 0x2ff   :  { %s765_s14 = scalar_lea.hbm %s1023_s7, 16 }
 0x300   :  { %p766_p5 = scmp.ne.s32.totalorder %s1023_s7, %s765_s14  ;;  %p769_p6 = scmp.lt.u32.totalorder %s765_s14, %s1023_s7 }
 0x302   :  { %p771_p7 = pnand %p769_p6, %p766_p5 }
 0x304   :  { %774 = shalt.err (!%p771_p7)
}
 0x305   :  { %542 = dma.vmem_to_hbm [thread:$0]  %s540_s10, 16, %s1023_s7, [#allocation4]  }
 0x306   :  { %775 = dma.done.wait [#allocation4], 16  }
 0x307   :  { %776 = vsyncadd [#allocation4], 4294967280 }
 0x308   :  { %546 = vsyncpa [#allocation4], 1 }

</bundles_post_ra>
